<compile_context>
chip_gen: v6e
topology: v6e:2x2x1
jax: 0.10.0
libtpu: 0.0.40
codegen_flags: <defaults>
</compile_context>

<pallas_src>
import jax
import jax.numpy as jnp
import numpy as np
from jax.experimental import pallas as pl
from jax.experimental.pallas import tpu as pltpu

K = 3             # kernel_size (module default path: k=3, s=1, p=1)
STRIDE = 1
PAD = 1
EPS = 1e-5        # BatchNorm2d default eps
NEG_SLOPE = 0.01  # nn.LeakyReLU() default negative_slope


def _make_conv_stats_kernel(cin, cout, h_out, w_out):
    """Pass 1: 3x3 conv (transposed-conv re-expressed as a conv with a flipped
    kernel) + bias, written lane-dense as (Cout, L); also emits per-image
    centered BatchNorm partial sums."""
    l = h_out * w_out
    padw = w_out + 1                     # covers the max flattened shift |s| = W+1

    def kernel(x_ref, w_ref, b_ref, mask_ref, conv_ref, stats_ref):
        x = x_ref[0]                                          # (Cin, L), lane-dense
        zpad = jnp.zeros((cin, padw), jnp.float32)
        xp = jnp.concatenate([zpad, x, zpad], axis=-1)        # (Cin, L + 2*(W+1)), VMEM only
        masks = mask_ref[...]                                 # (3, L) column-validity masks

        # Build the patch slab directly as (9*Cin, L): row (kh*3+kw)*Cin + ci is
        # x[ci, y-1+kh, z-1+kw] (zero outside the image).  Row over/underflow
        # lands in the zero padding; column wrap is killed by the per-dw mask.
        wins = []
        for kh in range(K):
            for kw in range(K):
                s = (kh - 1) * w_out + (kw - 1)               # flattened shift
                win = xp[:, padw + s: padw + s + l]           # (Cin, L), static slice
                if kw != 1:
                    win = win * masks[kw:kw + 1, :]           # zero invalid columns
                wins.append(win)
        patches = jnp.concatenate(wins, axis=0)               # (9*Cin, L)

        # Single MXU matmul, result already (Cout, L): no output transpose.
        acc = jnp.dot(w_ref[...], patches,
                      preferred_element_type=jnp.float32)     # (Cout, L)
        acc = acc + b_ref[...]                                # conv bias (Cout, 1)
        conv_ref[0] = acc.astype(conv_ref.dtype)              # lane-dense store

        # Per-image centered BatchNorm partial sums (lane reductions).
        s1 = jnp.sum(acc, axis=-1, keepdims=True)             # (Cout, 1)
        mean_t = s1 * (1.0 / l)
        d = acc - mean_t
        s2c = jnp.sum(d * d, axis=-1, keepdims=True)          # centered sum of squares
        stats_ref[0] = jnp.concatenate([s1, s2c], axis=-1)    # (Cout, 2)

    return kernel


def _bn_lrelu_kernel(conv_ref, scale_ref, shift_ref, o_ref):
    """Pass 2: y = conv*scale + shift, LeakyReLU; lane-dense (Cout, L) block."""
    y = conv_ref[0] * scale_ref[...] + shift_ref[...]
    o_ref[0] = jnp.where(y > 0, y, NEG_SLOPE * y).astype(o_ref.dtype)


@jax.jit
def dconvl_forward(x_nchw, w_t, bias, gamma, beta):
    """x_nchw: (N, Cin, H, W); w_t: ConvTranspose2d weight (Cin, Cout, K, K).
    Returns NCHW output matching PyTorch DConvL.forward (training-mode BN)."""
    n, cin, h, w = x_nchw.shape
    cout = w_t.shape[1]
    ho = (h - 1) * STRIDE - 2 * PAD + K   # == h for the module's default config
    wo = (w - 1) * STRIDE - 2 * PAD + K   # == w
    assert ho == h and wo == w            # flattened-lane indexing relies on this
    l = ho * wo
    m = n * l

    # ConvTranspose(s=1, p=1) == forward conv with the kernel flipped in both
    # spatial dims.  Weight is reshaped so the matmul LHS is (Cout, 9*Cin).
    w2 = jnp.transpose(w_t[:, :, ::-1, ::-1], (1, 2, 3, 0))          # (Cout, K, K, Cin)
    w2 = w2.reshape(cout, K * K * cin).astype(jnp.float32)           # (Cout, 9*Cin)
    b2 = bias.reshape(cout, 1).astype(jnp.float32)

    # Input stays NCHW; just merge the spatial dims (free reshape, no HBM copy,
    # no pad, no overlapping-tile stack).
    x_flat = x_nchw.astype(jnp.float32).reshape(n, cin, l)

    # Column-validity masks for the horizontal shifts dw = kw-1 (built once on
    # host, resident in VMEM across the whole grid).
    z = np.arange(l) % wo
    colmask = jnp.asarray(np.stack([
        (z >= 1).astype(np.float32),          # dw = -1
        np.ones(l, np.float32),               # dw =  0 (unused)
        (z <= wo - 2).astype(np.float32),     # dw = +1
    ], axis=0))                               # (3, L)

    # Generation-aware VMEM budgeting: double-buffered in/out blocks + resident
    # weights/masks + in-kernel temporaries (padded row, 9 windows, slab, acc).
    blk_in = cin * l * 4
    blk_out = (cout * l + cout * 2) * 4
    resident = (cout * K * K * cin + cout + 3 * l) * 4
    temps = (cin * (l + 2 * (wo + 1)) + 2 * 9 * cin * l + 3 * cout * l) * 4
    est = 2 * blk_in + 2 * blk_out + resident + temps
    # TODO(synk): for very large images (est >> 40 MiB, e.g. v7x's 64 MiB VMEM),
    # switch to row tiles with a manual overlapping-halo DMA (memory_space=pl.ANY
    # + pltpu.make_async_copy) instead of whole-image blocks.
    assert est <= (40 << 20)
    vmem_limit = int(min(max(2 * est, 16 << 20), 40 << 20))

    conv_kernel = _make_conv_stats_kernel(cin, cout, ho, wo)
    conv_flat, stats = pl.pallas_call(
        conv_kernel,
        grid=(n,),
        in_specs=[
            pl.BlockSpec((1, cin, l), lambda ni: (ni, 0, 0)),
            pl.BlockSpec((cout, K * K * cin), lambda ni: (0, 0)),
            pl.BlockSpec((cout, 1), lambda ni: (0, 0)),
            pl.BlockSpec((3, l), lambda ni: (0, 0)),
        ],
        out_specs=(
            pl.BlockSpec((1, cout, l), lambda ni: (ni, 0, 0)),
            pl.BlockSpec((1, cout, 2), lambda ni: (ni, 0, 0)),
        ),
        out_shape=(
            jax.ShapeDtypeStruct((n, cout, l), jnp.float32),
            jax.ShapeDtypeStruct((n, cout, 2), jnp.float32),
        ),
        compiler_params=pltpu.CompilerParams(
            dimension_semantics=("parallel",),
            vmem_limit_bytes=vmem_limit),
        cost_estimate=pl.CostEstimate(
            flops=2 * m * (K * K * cin) * cout,
            transcendentals=0,
            bytes_accessed=4 * (n * cin * l + cout * K * K * cin + cout + 3 * l
                                + n * cout * l + n * cout * 2)),
    )(x_flat, w2, b2, colmask)

    # Tiny cross-image reduction -> BN scale/shift (training-mode batch stats).
    s1 = stats[..., 0]                                   # (N, Cout) per-image sums
    s2c = stats[..., 1]                                  # per-image centered sumsq
    g32 = gamma.astype(jnp.float32)
    mean = jnp.sum(s1, axis=0) / m                       # (Cout,)
    mean_n = s1 / l
    var = (jnp.sum(s2c, axis=0)
           + l * jnp.sum((mean_n - mean) ** 2, axis=0)) / m
    var = jnp.maximum(var, 0.0)                          # guard tiny negative cancellation
    inv = jax.lax.rsqrt(var + EPS)
    scale = (g32 * inv).reshape(cout, 1)
    shift = (beta.astype(jnp.float32) - mean * g32 * inv).reshape(cout, 1)

    out_flat = pl.pallas_call(
        _bn_lrelu_kernel,
        grid=(n,),
        in_specs=[
            pl.BlockSpec((1, cout, l), lambda ni: (ni, 0, 0)),
            pl.BlockSpec((cout, 1), lambda ni: (0, 0)),
            pl.BlockSpec((cout, 1), lambda ni: (0, 0)),
        ],
        out_specs=pl.BlockSpec((1, cout, l), lambda ni: (ni, 0, 0)),
        out_shape=jax.ShapeDtypeStruct((n, cout, l), jnp.float32),
        input_output_aliases={0: 0},    # normalize in place: no extra HBM buffer
        compiler_params=pltpu.CompilerParams(
            dimension_semantics=("parallel",),
            vmem_limit_bytes=vmem_limit),
    )(conv_flat, scale, shift)

    # (N, Cout, H*W) is already NCHW-ordered: plain reshape, no transpose.
    return out_flat.reshape(n, cout, ho, wo)


def _reference_forward(x, w_t, b, gamma, beta):
    """Pure-numpy reference of ConvTranspose2d + BatchNorm2d(train) + LeakyReLU."""
    x = np.asarray(x, np.float64)
    w_t = np.asarray(w_t, np.float64)
    n, cin, h, w = x.shape
    cout = w_t.shape[1]
    ho = (h - 1) * STRIDE - 2 * PAD + K
    wo = (w - 1) * STRIDE - 2 * PAD + K
    out = np.zeros((n, cout, ho, wo), np.float64)
    for i in range(h):
        for j in range(w):
            for kh in range(K):
                for kw in range(K):
                    y = i * STRIDE - PAD + kh
                    z = j * STRIDE - PAD + kw
                    if 0 <= y < ho and 0 <= z < wo:
                        out[:, :, y, z] += x[:, :, i, j] @ w_t[:, :, kh, kw]
    out += np.asarray(b, np.float64)[None, :, None, None]
    mean = out.mean(axis=(0, 2, 3), keepdims=True)
    var = out.var(axis=(0, 2, 3), keepdims=True)   # biased (training-mode BN)
    yv = (out - mean) / np.sqrt(var + EPS)
    yv = yv * np.asarray(gamma, np.float64)[None, :, None, None] \
        + np.asarray(beta, np.float64)[None, :, None, None]
    return np.where(yv > 0, yv, NEG_SLOPE * yv)


if __name__ == "__main__":
    N, CIN, COUT, H, W = 2, 4, 8, 16, 16

    key = jax.random.PRNGKey(0)
    kx, kw_, kb = jax.random.split(key, 3)

    x = jax.random.normal(kx, (N, CIN, H, W), jnp.float32)
    # ConvTranspose2d weight shape: (in_ch, out_ch, K, K); deterministic init.
    fan = CIN * K * K
    bound = 1.0 / np.sqrt(fan)
    w_t = jax.random.uniform(kw_, (CIN, COUT, K, K), jnp.float32, -bound, bound)
    bias = jax.random.uniform(kb, (COUT,), jnp.float32, -bound, bound)
    gamma = jnp.ones((COUT,), jnp.float32)    # BatchNorm2d default weight
    beta = jnp.zeros((COUT,), jnp.float32)    # BatchNorm2d default bias

    out = dconvl_forward(x, w_t, bias, gamma, beta)
    out = jax.block_until_ready(out)

    ref = _reference_forward(x, w_t, bias, gamma, beta)
    np.testing.assert_allclose(np.asarray(out), ref, rtol=1e-4, atol=1e-4)

    print("KERNEL_OK")
</pallas_src>

<mosaic_0001>
module attributes {stable_mosaic.version = 11 : i64} {
  func.func @kernel(%arg0: i32, %arg1: memref<1x4x256xf32, #tpu.memory_space<vmem>>, %arg2: memref<8x36xf32, #tpu.memory_space<vmem>>, %arg3: memref<8x1xf32, #tpu.memory_space<vmem>>, %arg4: memref<3x256xf32, #tpu.memory_space<vmem>>, %arg5: memref<1x8x256xf32, #tpu.memory_space<vmem>>, %arg6: memref<1x8x2xf32, #tpu.memory_space<vmem>>) attributes {dimension_semantics = [#tpu.dimension_semantics<parallel>], iteration_bounds = array<i64: 2>, scalar_prefetch = 0 : i64, scratch_operands = 0 : i64, tpu.core_type = #tpu.core_type<tc>, window_params = [{transform_indices = @transform_0, window_bounds = array<i64: 1, 4, 256>}, {pipeline_mode = #tpu.pipeline_mode<synchronous>, transform_indices = @transform_1, window_bounds = array<i64: 8, 36>}, {pipeline_mode = #tpu.pipeline_mode<synchronous>, transform_indices = @transform_2, window_bounds = array<i64: 8, 1>}, {pipeline_mode = #tpu.pipeline_mode<synchronous>, transform_indices = @transform_3, window_bounds = array<i64: 3, 256>}, {transform_indices = @transform_4, window_bounds = array<i64: 1, 8, 256>}, {transform_indices = @transform_5, window_bounds = array<i64: 1, 8, 2>}]} {
    %c0 = arith.constant 0 : index
    %c0_0 = arith.constant 0 : index
    %c0_1 = arith.constant 0 : index
    %0 = vector.load %arg1[%c0, %c0_0, %c0_1] : memref<1x4x256xf32, #tpu.memory_space<vmem>>, vector<1x4x256xf32>
    %1 = vector.shape_cast %0 : vector<1x4x256xf32> to vector<4x256xf32>
    %cst = arith.constant 0.000000e+00 : f32
    %2 = vector.broadcast %cst : f32 to vector<4x17xf32>
    %3 = tpu.concatenate %2, %1, %2 in 1 : vector<4x17xf32>, vector<4x256xf32>, vector<4x17xf32> -> vector<4x290xf32>
    %c0_2 = arith.constant 0 : index
    %c0_3 = arith.constant 0 : index
    %4 = vector.load %arg4[%c0_2, %c0_3] : memref<3x256xf32, #tpu.memory_space<vmem>>, vector<3x256xf32>
    %5 = vector.extract_strided_slice %3 {offsets = [0, 0], sizes = [4, 256], strides = [1, 1]} : vector<4x290xf32> to vector<4x256xf32>
    %6 = vector.extract_strided_slice %4 {offsets = [0, 0], sizes = [1, 256], strides = [1, 1]} : vector<3x256xf32> to vector<1x256xf32>
    %7 = vector.broadcast %6 : vector<1x256xf32> to vector<4x256xf32>
    %8 = arith.mulf %5, %7 : vector<4x256xf32>
    %9 = vector.extract_strided_slice %3 {offsets = [0, 1], sizes = [4, 256], strides = [1, 1]} : vector<4x290xf32> to vector<4x256xf32>
    %10 = vector.extract_strided_slice %3 {offsets = [0, 2], sizes = [4, 256], strides = [1, 1]} : vector<4x290xf32> to vector<4x256xf32>
    %11 = vector.extract_strided_slice %4 {offsets = [2, 0], sizes = [1, 256], strides = [1, 1]} : vector<3x256xf32> to vector<1x256xf32>
    %12 = vector.broadcast %11 : vector<1x256xf32> to vector<4x256xf32>
    %13 = arith.mulf %10, %12 : vector<4x256xf32>
    %14 = vector.extract_strided_slice %3 {offsets = [0, 16], sizes = [4, 256], strides = [1, 1]} : vector<4x290xf32> to vector<4x256xf32>
    %15 = vector.extract_strided_slice %4 {offsets = [0, 0], sizes = [1, 256], strides = [1, 1]} : vector<3x256xf32> to vector<1x256xf32>
    %16 = vector.broadcast %15 : vector<1x256xf32> to vector<4x256xf32>
    %17 = arith.mulf %14, %16 : vector<4x256xf32>
    %18 = vector.extract_strided_slice %3 {offsets = [0, 17], sizes = [4, 256], strides = [1, 1]} : vector<4x290xf32> to vector<4x256xf32>
    %19 = vector.extract_strided_slice %3 {offsets = [0, 18], sizes = [4, 256], strides = [1, 1]} : vector<4x290xf32> to vector<4x256xf32>
    %20 = vector.extract_strided_slice %4 {offsets = [2, 0], sizes = [1, 256], strides = [1, 1]} : vector<3x256xf32> to vector<1x256xf32>
    %21 = vector.broadcast %20 : vector<1x256xf32> to vector<4x256xf32>
    %22 = arith.mulf %19, %21 : vector<4x256xf32>
    %23 = vector.extract_strided_slice %3 {offsets = [0, 32], sizes = [4, 256], strides = [1, 1]} : vector<4x290xf32> to vector<4x256xf32>
    %24 = vector.extract_strided_slice %4 {offsets = [0, 0], sizes = [1, 256], strides = [1, 1]} : vector<3x256xf32> to vector<1x256xf32>
    %25 = vector.broadcast %24 : vector<1x256xf32> to vector<4x256xf32>
    %26 = arith.mulf %23, %25 : vector<4x256xf32>
    %27 = vector.extract_strided_slice %3 {offsets = [0, 33], sizes = [4, 256], strides = [1, 1]} : vector<4x290xf32> to vector<4x256xf32>
    %28 = vector.extract_strided_slice %3 {offsets = [0, 34], sizes = [4, 256], strides = [1, 1]} : vector<4x290xf32> to vector<4x256xf32>
    %29 = vector.extract_strided_slice %4 {offsets = [2, 0], sizes = [1, 256], strides = [1, 1]} : vector<3x256xf32> to vector<1x256xf32>
    %30 = vector.broadcast %29 : vector<1x256xf32> to vector<4x256xf32>
    %31 = arith.mulf %28, %30 : vector<4x256xf32>
    %32 = tpu.concatenate %8, %9, %13, %17, %18, %22, %26, %27, %31 in 0 : vector<4x256xf32>, vector<4x256xf32>, vector<4x256xf32>, vector<4x256xf32>, vector<4x256xf32>, vector<4x256xf32>, vector<4x256xf32>, vector<4x256xf32>, vector<4x256xf32> -> vector<36x256xf32>
    %c0_4 = arith.constant 0 : index
    %c0_5 = arith.constant 0 : index
    %33 = vector.load %arg2[%c0_4, %c0_5] : memref<8x36xf32, #tpu.memory_space<vmem>>, vector<8x36xf32>
    %cst_6 = arith.constant dense<0.000000e+00> : vector<8x256xf32>
    %34 = tpu.matmul %33, %32, %cst_6 {dimension_numbers = #tpu.dot_dimension_numbers<[1], [0], [0], [1], [0, 0, 1, 1], [], []>} : vector<8x36xf32>, vector<36x256xf32>, vector<8x256xf32> -> vector<8x256xf32>
    %c0_7 = arith.constant 0 : index
    %c0_8 = arith.constant 0 : index
    %35 = vector.load %arg3[%c0_7, %c0_8] : memref<8x1xf32, #tpu.memory_space<vmem>>, vector<8x1xf32>
    %36 = vector.broadcast %35 : vector<8x1xf32> to vector<8x256xf32>
    %37 = arith.addf %34, %36 : vector<8x256xf32>
    %c0_9 = arith.constant 0 : index
    %c0_10 = arith.constant 0 : index
    %c0_11 = arith.constant 0 : index
    %38 = vector.load %arg5[%c0_9, %c0_10, %c0_11] : memref<1x8x256xf32, #tpu.memory_space<vmem>>, vector<1x8x256xf32>
    %39 = vector.shape_cast %38 : vector<1x8x256xf32> to vector<8x256xf32>
    %40 = vector.shape_cast %37 : vector<8x256xf32> to vector<1x8x256xf32>
    tpu.vector_store %arg5[%c0_9, %c0_10, %c0_11], %40 {strides = array<i32>} : memref<1x8x256xf32, #tpu.memory_space<vmem>>, vector<1x8x256xf32>,
    %cst_12 = arith.constant dense<0.000000e+00> : vector<8xf32>
    %41 = vector.multi_reduction <add>, %37, %cst_12 [1] : vector<8x256xf32> to vector<8xf32>
    %42 = vector.shape_cast %41 : vector<8xf32> to vector<8x1xf32>
    %cst_13 = arith.constant 3.906250e-03 : f32
    %43 = vector.broadcast %cst_13 : f32 to vector<8x1xf32>
    %44 = arith.mulf %42, %43 : vector<8x1xf32>
    %45 = vector.broadcast %44 : vector<8x1xf32> to vector<8x256xf32>
    %46 = arith.subf %37, %45 : vector<8x256xf32>
    %47 = arith.mulf %46, %46 : vector<8x256xf32>
    %cst_14 = arith.constant dense<0.000000e+00> : vector<8xf32>
    %48 = vector.multi_reduction <add>, %47, %cst_14 [1] : vector<8x256xf32> to vector<8xf32>
    %49 = vector.shape_cast %48 : vector<8xf32> to vector<8x1xf32>
    %50 = tpu.concatenate %42, %49 in 1 : vector<8x1xf32>, vector<8x1xf32> -> vector<8x2xf32>
    %c0_15 = arith.constant 0 : index
    %c0_16 = arith.constant 0 : index
    %c0_17 = arith.constant 0 : index
    %51 = vector.load %arg6[%c0_15, %c0_16, %c0_17] : memref<1x8x2xf32, #tpu.memory_space<vmem>>, vector<1x8x2xf32>
    %52 = vector.shape_cast %51 : vector<1x8x2xf32> to vector<8x2xf32>
    %53 = vector.shape_cast %50 : vector<8x2xf32> to vector<1x8x2xf32>
    tpu.vector_store %arg6[%c0_15, %c0_16, %c0_17], %53 {strides = array<i32>} : memref<1x8x2xf32, #tpu.memory_space<vmem>>, vector<1x8x2xf32>,
    return
  }
  func.func @transform_0(%arg0: i32) -> (i32, i32, i32) {
    %c0_i32 = arith.constant 0 : i32
    %c0_i32_0 = arith.constant 0 : i32
    %c0_i32_1 = arith.constant 0 : i32
    return %arg0, %c0_i32, %c0_i32_0 : i32, i32, i32
  }
  func.func @transform_1(%arg0: i32) -> (i32, i32) {
    %c0_i32 = arith.constant 0 : i32
    %c0_i32_0 = arith.constant 0 : i32
    %c0_i32_1 = arith.constant 0 : i32
    return %c0_i32, %c0_i32_0 : i32, i32
  }
  func.func @transform_2(%arg0: i32) -> (i32, i32) {
    %c0_i32 = arith.constant 0 : i32
    %c0_i32_0 = arith.constant 0 : i32
    %c0_i32_1 = arith.constant 0 : i32
    return %c0_i32, %c0_i32_0 : i32, i32
  }
  func.func @transform_3(%arg0: i32) -> (i32, i32) {
    %c0_i32 = arith.constant 0 : i32
    %c0_i32_0 = arith.constant 0 : i32
    %c0_i32_1 = arith.constant 0 : i32
    return %c0_i32, %c0_i32_0 : i32, i32
  }
  func.func @transform_4(%arg0: i32) -> (i32, i32, i32) {
    %c0_i32 = arith.constant 0 : i32
    %c0_i32_0 = arith.constant 0 : i32
    %c0_i32_1 = arith.constant 0 : i32
    return %arg0, %c0_i32, %c0_i32_0 : i32, i32, i32
  }
  func.func @transform_5(%arg0: i32) -> (i32, i32, i32) {
    %c0_i32 = arith.constant 0 : i32
    %c0_i32_0 = arith.constant 0 : i32
    %c0_i32_1 = arith.constant 0 : i32
    return %arg0, %c0_i32, %c0_i32_0 : i32, i32, i32
  }
}

module attributes {stable_mosaic.version = 11 : i64} {
  func.func @_bn_lrelu_kernel(%arg0: i32, %arg1: memref<1x8x256xf32, #tpu.memory_space<vmem>>, %arg2: memref<8x1xf32, #tpu.memory_space<vmem>>, %arg3: memref<8x1xf32, #tpu.memory_space<vmem>>, %arg4: memref<1x8x256xf32, #tpu.memory_space<vmem>>) attributes {dimension_semantics = [#tpu.dimension_semantics<parallel>], iteration_bounds = array<i64: 2>, scalar_prefetch = 0 : i64, scratch_operands = 0 : i64, tpu.core_type = #tpu.core_type<tc>, window_params = [{transform_indices = @transform_0, window_bounds = array<i64: 1, 8, 256>}, {pipeline_mode = #tpu.pipeline_mode<synchronous>, transform_indices = @transform_1, window_bounds = array<i64: 8, 1>}, {pipeline_mode = #tpu.pipeline_mode<synchronous>, transform_indices = @transform_2, window_bounds = array<i64: 8, 1>}, {transform_indices = @transform_3, window_bounds = array<i64: 1, 8, 256>}]} {
    %c0 = arith.constant 0 : index
    %c0_0 = arith.constant 0 : index
    %c0_1 = arith.constant 0 : index
    %0 = vector.load %arg1[%c0, %c0_0, %c0_1] : memref<1x8x256xf32, #tpu.memory_space<vmem>>, vector<1x8x256xf32>
    %1 = vector.shape_cast %0 : vector<1x8x256xf32> to vector<8x256xf32>
    %c0_2 = arith.constant 0 : index
    %c0_3 = arith.constant 0 : index
    %2 = vector.load %arg2[%c0_2, %c0_3] : memref<8x1xf32, #tpu.memory_space<vmem>>, vector<8x1xf32>
    %3 = vector.broadcast %2 : vector<8x1xf32> to vector<8x256xf32>
    %4 = arith.mulf %1, %3 : vector<8x256xf32>
    %c0_4 = arith.constant 0 : index
    %c0_5 = arith.constant 0 : index
    %5 = vector.load %arg3[%c0_4, %c0_5] : memref<8x1xf32, #tpu.memory_space<vmem>>, vector<8x1xf32>
    %6 = vector.broadcast %5 : vector<8x1xf32> to vector<8x256xf32>
    %7 = arith.addf %4, %6 : vector<8x256xf32>
    %cst = arith.constant 0.000000e+00 : f32
    %8 = vector.broadcast %cst : f32 to vector<8x256xf32>
    %9 = arith.cmpf ogt, %7, %8 : vector<8x256xf32>
    %cst_6 = arith.constant 0.00999999977 : f32
    %10 = vector.broadcast %cst_6 : f32 to vector<8x256xf32>
    %11 = arith.mulf %10, %7 : vector<8x256xf32>
    %12 = arith.select %9, %7, %11 : vector<8x256xi1>, vector<8x256xf32>
    %c0_7 = arith.constant 0 : index
    %c0_8 = arith.constant 0 : index
    %c0_9 = arith.constant 0 : index
    %13 = vector.load %arg4[%c0_7, %c0_8, %c0_9] : memref<1x8x256xf32, #tpu.memory_space<vmem>>, vector<1x8x256xf32>
    %14 = vector.shape_cast %13 : vector<1x8x256xf32> to vector<8x256xf32>
    %15 = vector.shape_cast %12 : vector<8x256xf32> to vector<1x8x256xf32>
    tpu.vector_store %arg4[%c0_7, %c0_8, %c0_9], %15 {strides = array<i32>} : memref<1x8x256xf32, #tpu.memory_space<vmem>>, vector<1x8x256xf32>,
    return
  }
  func.func @transform_0(%arg0: i32) -> (i32, i32, i32) {
    %c0_i32 = arith.constant 0 : i32
    %c0_i32_0 = arith.constant 0 : i32
    %c0_i32_1 = arith.constant 0 : i32
    return %arg0, %c0_i32, %c0_i32_0 : i32, i32, i32
  }
  func.func @transform_1(%arg0: i32) -> (i32, i32) {
    %c0_i32 = arith.constant 0 : i32
    %c0_i32_0 = arith.constant 0 : i32
    %c0_i32_1 = arith.constant 0 : i32
    return %c0_i32, %c0_i32_0 : i32, i32
  }
  func.func @transform_2(%arg0: i32) -> (i32, i32) {
    %c0_i32 = arith.constant 0 : i32
    %c0_i32_0 = arith.constant 0 : i32
    %c0_i32_1 = arith.constant 0 : i32
    return %c0_i32, %c0_i32_0 : i32, i32
  }
  func.func @transform_3(%arg0: i32) -> (i32, i32, i32) {
    %c0_i32 = arith.constant 0 : i32
    %c0_i32_0 = arith.constant 0 : i32
    %c0_i32_1 = arith.constant 0 : i32
    return %arg0, %c0_i32, %c0_i32_0 : i32, i32, i32
  }
}

</mosaic_0001>

<bundles_post_ra>
// kernel: dconvl_forward.3
= control target key start
LH: loop header
LB: loop body
LE: loop exit
PB: predicated region body
PF: predicated region fallthrough
CT: control target
= control target key end

     0   :  { %s304_s12 = smov 0   ;;  %s327_s0 = inlined_call_operand.vmem [shape: f32[2,8,256], index: 0, kind: input, shape index: {}, may-alias: {0,3}]   ;;  %s328_s1 = inlined_call_operand.vmem [shape: f32[8,1], index: 1, kind: input, shape index: {}]   ;;  %s329_s2 = inlined_call_operand.vmem [shape: f32[8,1], index: 2, kind: input, shape index: {}]   ;;  %s330_s3 = inlined_call_operand.vmem [shape: f32[2,8,256], index: 3, kind: output, shape index: {}, may-alias: {0,3}]  }
   0x1 LB: > { %s252_s13 = sadd.s32 4294967295, %s281_s12   ;;  %p256_p0 = scmp.ge.s32.totalorder %s281_s12, 1  ;;  %s281_s12 = sphi %s304_s12, %s13_s12  }
   0x2   : > { %p137_p1 = scmp.lt.s32.totalorder %s281_s12, 3 }
   0x4   : > { %p138_p2 = pnand %p256_p0, %p137_p1 }
   0x5   : > { %p161_p3 = scmp.lt.s32.totalorder (!%p138_p2), %s252_s13, 1 }
   0x6   : > { %141 = sbr.rel (%p138_p2) target bundleno = 147 (0x93), region = 32 }
   0xb   : > { %v173_v0 = vld [vmem:[%s328_s1] sm:$0xff]  ;;  %v283_v1 = vmov 0   ;;  %s332_s13 = smov (!%p161_p3, %s252_s13), 1 }
   0xc   : > { %274 = vset.pattern.permute.xlu0 %v283_v1  ;;  %v181_v2 = vld [vmem:[%s329_s2] sm:$0xff]  ;;  %s263_s18 = sshll.u32 %s332_s13, 4 }
   0xd   : > { %176 = vperm.xlu0 %274, %v173_v0   ;;  %s165_s21 = scalar_lea.vmem %s327_s0, %s263_s18  ;;  %s170_s24 = scalar_lea.vmem %s330_s3, %s263_s18 }
   0xe   : > { %v171_v4 = vld [vmem:[%s165_s21] sm:$0xff]  ;;  %v172_v5 = vld [vmem:[%s165_s21 + $0x8] sm:$0xff] }
  0x11   : > { %184 = vperm.xlu0 %274, %v181_v2  }
  0x88   : > { %v177_v3 = vpop.permute.xlu0 %176 }
  0x89   : > { %v179_v6 = vmul.f32 %v177_v3, %v171_v4  ;;  %v180_v7 = vmul.f32 %v177_v3, %v172_v5 }
  0x8c   : > { %v185_v8 = vpop.permute.xlu0 %184 }
  0x8d   : > { %v187_v9 = vadd.f32 %v185_v8, %v179_v6  ;;  %v188_v10 = vadd.f32 %v185_v8, %v180_v7 }
  0x8f   : > { %vm189_vm0 = vcmp.gt.f32.partialorder %v187_v9, 0.0  ;;  %vm190_vm1 = vcmp.gt.f32.partialorder %v188_v10, 0.0  ;;  %v191_v11 = vmul.f32 0.01, %v187_v9  ;;  %v192_v12 = vmul.f32 0.01, %v188_v10 }
  0x91   : > { %v193_v13 = vsel %vm189_vm0, %v187_v9, %v191_v11  ;;  %v194_v14 = vsel %vm190_vm1, %v188_v10, %v192_v12 }
  0x92   : > { %195 = vst [vmem:[%s170_s24] sm:$0xff] %v193_v13  ;;  %196 = vst [vmem:[%s170_s24 + $0x8] sm:$0xff] %v194_v14 }
  0x93 PF: > { %s13_s12 = sadd.s32 1, %s281_s12  }
  0x94   : > { %p10_p4 = scmp.ge.s32.totalorder %s13_s12, 4  }
  0x96   :  { %12 = sbr.rel (!%p10_p4) target bundleno = 1 (0x1), region = 62 }

// kernel: dconvl_forward.2
= control target key start
LH: loop header
LB: loop body
LE: loop exit
PB: predicated region body
PF: predicated region fallthrough
CT: control target
= control target key end

     0   :  { %s760_s18 = smov 0   ;;  %s855_s0 = inlined_call_operand.vmem [shape: f32[2,4,256], index: 0, kind: input, shape index: {}]   ;;  %s856_s1 = inlined_call_operand.vmem [shape: f32[8,36], index: 1, kind: input, shape index: {}]   ;;  %s857_s2 = inlined_call_operand.vmem [shape: f32[8,1], index: 2, kind: input, shape index: {}]   ;;  %s858_s3 = inlined_call_operand.vmem [shape: f32[3,256], index: 3, kind: input, shape index: {}]   ;;  %s859_s4 = inlined_call_operand.vmem [shape: f32[2,8,256], index: 4, kind: output, shape index: {0}]   ;;  %s860_s5 = inlined_call_operand.vmem [shape: f32[2,8,2], index: 5, kind: output, shape index: {1}]  }
   0x1 LB: > { %s663_s19 = sadd.s32 4294967295, %s712_s18   ;;  %p667_p0 = scmp.ge.s32.totalorder %s712_s18, 1  ;;  %s712_s18 = sphi %s760_s18, %s16_s18  }
   0x2   : > { %p190_p1 = scmp.lt.s32.totalorder %s712_s18, 3 }
   0x4   : > { %p191_p2 = pnand %p667_p0, %p190_p1 }
   0x5   : > { %p222_p3 = scmp.lt.s32.totalorder (!%p191_p2), %s663_s19, 1  ;;  %s714_s26 = smov (!%p191_p2), 17  }
   0x6   : > { %194 = sbr.rel (%p191_p2) target bundleno = 790 (0x316), region = 36  ;;  %s715_s27 = smov (!%p191_p2), 34  }
   0x7   : > { %s716_s28 = smov (!%p191_p2), 18   ;;  %s717_s29 = smov (!%p191_p2), 32  }
   0x8   : > { %s718_s30 = smov (!%p191_p2), 16   ;;  %s719_s6 = smov (!%p191_p2), 2  }
   0x9   : > { %s720_s7 = smov (!%p191_p2), 111   ;;  %s721_s8 = smov (!%p191_p2), 95  }
   0xa   : > { %s722_s9 = smov (!%p191_p2), 94   ;;  %s723_s10 = smov (!%p191_p2), 96  }
   0xb   : > { %v252_v0 = vlaneseq  ;;  %s862_s19 = smov (!%p222_p3, %s663_s19), 1  ;;  %v250_v2 = vld [vmem:[%s858_s3] sm:$0x77]  ;;  %vm243_vm0 = vcmask 138240   ;;  %vm346_vm1 = vcmask 277504   ;;  %vm334_vm2 = vcmask 261120  }
   0xc   : > { %s678_s22 = sshll.u32 %s862_s19, 3  ;;  %s724_s11 = smov 126   ;;  %vm322_vm3 = vcmask 146432   ;;  %vm296_vm4 = vcmask 15360   ;;  %vm310_vm5 = vcmask 130048   ;;  %v727_v60 = vmov 0.0  }
   0xd   : > { %v253_v1 = vshrl.u32 %v252_v0, 7  ;;  %s226_s25 = scalar_lea.vmem %s855_s0, %s678_s22  ;;  %s725_s12 = smov 127   ;;  %554 = vmatprep.mubr.f32.mxu0 %v727_v60  ;;  %v729_v61 = vmov 0   ;;  %v476_v63 = vld [vmem:[%s857_s2] sm:$0xff]  ;;  %vm463_vm6 = vcmask 769024   ;;  %vm466_vm7 = vcmask 1043456  }
   0xe   : > { %v236_v5 = vld [vmem:[%s226_s25] sm:$0xff]  ;;  %s726_s13 = smov 110   ;;  %s728_s14 = smov 112   ;;  %704 = vset.pattern.permute.xlu0 %v729_v61  ;;  %vm449_vm8 = vcmask 777216   ;;  %vm438_vm9 = vcmask 785408   ;;  %vm407_vm10 = vcmask 908288  }
   0xf   : > { %v274_v3 = vsub.s32 2, %v253_v1  ;;  %v278_v4 = vsub.s32 6, %v253_v1  ;;  %239 = vrot.lane.b32.xlu0 %v236_v5, %s714_s26  ;;  %v238_v8 = vcombine.high %v236_v5, %v236_v5  ;;  %v254_v9 = vsub.s32 0, %v253_v1  ;;  %s679_s21 = sshll.u32 %s862_s19, 4 }
  0x10   : > { %v258_v12 = vsub.s32 4, %v253_v1  ;;  %vm424_vm11 = vcmask 900096   ;;  %vm379_vm12 = vcmask 1031168   ;;  %vm396_vm13 = vcmask 916480   ;;  %s231_s25 = scalar_lea.vmem %s859_s4, %s679_s21 }
  0x11   : > { %v275_v6 = vrot.slane %v250_v2, %v274_v3  ;;  %v279_v7 = vrot.slane %v250_v2, %v278_v4  ;;  %v255_v13 = vrot.slane %v250_v2, %v254_v9  ;;  %vm365_vm14 = vcmask 1039360  }
  0x12   : > { %v259_v14 = vrot.slane %v250_v2, %v258_v12  ;;  %vm482_vm15 = vcmask 293888  }
  0x13   : > { %v285_v10 = vrot.slane %v275_v6, %v274_v3  ;;  %v289_v11 = vrot.slane %v279_v7, %v274_v3  ;;  %241 = vrot.lane.b32.xlu0 %v238_v8, %s714_s26  ;;  %v779_v15 = vrot.slane %v255_v13, %v254_v9 }
  0x14   : > { %v781_v16 = vrot.slane %v259_v14, %v254_v9 }
  0x15   : > { %342 = vrot.lane.b32.xlu1 %v285_v10, %s715_s27 }
  0x17   : > { %318 = vrot.lane.b32.xlu0 %v285_v10, %s716_s28 }
  0x19   : > { %344 = vrot.lane.b32.xlu1 %v289_v11, %s715_s27 }
  0x1b   : > { %330 = vrot.lane.b32.xlu0 %v779_v15, %s717_s29 }
  0x1d   : > { %320 = vrot.lane.b32.xlu1 %v289_v11, %s716_s28  ;;  %s235_s28 = scalar_lea.vmem %s860_s5, %s678_s22 }
  0x1f   : > { %306 = vrot.lane.b32.xlu0 %v779_v15, %s718_s30 }
  0x21   : > { %332 = vrot.lane.b32.xlu1 %v781_v16, %s717_s29 }
  0x23   : > { %292 = vrot.lane.b32.xlu0 %v285_v10, %s719_s6 }
  0x25   : > { %308 = vrot.lane.b32.xlu1 %v781_v16, %s718_s30 }
  0x29   : > { %294 = vrot.lane.b32.xlu1 %v289_v11, %s719_s6 }
  0x81   : > { %v240_v17 = vpop.permute.xlu0 %239 }
  0x82   : > { %v787_v18 = vsel %vm243_vm0, 0.0, %v240_v17 }
  0x83   : > { %401 = vrot.lane.b32.xlu1 %v787_v18, %s720_s7  ;;  %v356_v19 = vrot.slane %v787_v18, 4 }
  0x85   : > { %443 = vrot.lane.b32.xlu0 %v356_v19, %s721_s8  ;;  %v242_v21 = vpop.permute.xlu0 %241 }
  0x86   : > { %v793_v22 = vsel %vm243_vm0, %v240_v17, %v242_v21  ;;  %v795_v23 = vsel %vm243_vm0, %v242_v21, 0.0  ;;  %vm574_vm0 = vcmask 7168  }
  0x87   : > { %v343_v20 = vpop.permute.xlu1 %342  ;;  %403 = vrot.lane.b32.xlu1 %v793_v22, %s720_s7  ;;  %v357_v27 = vrot.slane %v793_v22, 4  ;;  %v358_v35 = vrot.slane %v795_v23, 4 }
  0x88   : > { %v351_v30 = vmul.f32 %v343_v20, %v787_v18 }
  0x89   : > { %405 = vrot.lane.b32.xlu0 %v795_v23, %s720_s7  ;;  %v319_v26 = vpop.permute.xlu0 %318 }
  0x8a   : > { %v327_v48 = vmul.f32 %v319_v26, %v787_v18 }
  0x8b   : > { %v345_v24 = vpop.permute.xlu1 %344 }
  0x8c   : > { %v353_v25 = vmul.f32 %v345_v24, %v795_v23  ;;  %v347_v39 = vsel %vm346_vm1, %v343_v20, %v345_v24  ;;  %v415_v53 = vrot.slane %v327_v48, 4 }
  0x8d   : > { %445 = vrot.lane.b32.xlu0 %v357_v27, %s721_s8  ;;  %v331_v29 = vpop.permute.xlu0 %330  ;;  %v352_v41 = vmul.f32 %v347_v39, %v793_v22 }
  0x8e   : > { %461 = vrot.lane.b32.xlu1 %v353_v25, %s722_s9  ;;  %v339_v37 = vmul.f32 %v331_v29, %v787_v18 }
  0x8f   : > { %v321_v28 = vpop.permute.xlu1 %320 }
  0x90   : > { %v329_v44 = vmul.f32 %v321_v28, %v795_v23  ;;  %v323_v46 = vsel %vm322_vm3, %v319_v26, %v321_v28 }
  0x91   : > { %457 = vrot.lane.b32.xlu0 %v351_v30, %s722_s9  ;;  %v307_v33 = vpop.permute.xlu0 %306  ;;  %v328_v49 = vmul.f32 %v323_v46, %v793_v22 }
  0x92   : > { %v417_v50 = vrot.slane %v329_v44, 4  ;;  %v315_v57 = vmul.f32 %v307_v33, %v787_v18 }
  0x93   : > { %v333_v31 = vpop.permute.xlu1 %332  ;;  %v416_v54 = vrot.slane %v328_v49, 4  ;;  %v271_v49 = vmul.f32 %v781_v16, %v793_v22 }
  0x94   : > { %v341_v32 = vmul.f32 %v333_v31, %v795_v23  ;;  %v335_v43 = vsel %vm334_vm2, %v331_v29, %v333_v31  ;;  %v387_v62 = vrot.slane %v315_v57, 4 }
  0x95   : > { %v293_v40 = vpop.permute.xlu0 %292  ;;  %v340_v45 = vmul.f32 %v335_v43, %v793_v22 }
  0x96   : > { %436 = vrot.lane.b32.xlu1 %v341_v32, %s723_s10  ;;  %v301_v42 = vmul.f32 %v293_v40, %v787_v18 }
  0x97   : > { %v309_v34 = vpop.permute.xlu1 %308 }
  0x98   : > { %v311_v52 = vsel %vm310_vm5, %v307_v33, %v309_v34  ;;  %v317_v56 = vmul.f32 %v309_v34, %v795_v23 }
  0x99   : > { %v316_v55 = vmul.f32 %v311_v52, %v793_v22 }
  0x9a   : > { %447 = vrot.lane.b32.xlu1 %v358_v35, %s721_s8  ;;  %v389_v59 = vrot.slane %v317_v56, 4 }
  0x9b   : > { %v295_v36 = vpop.permute.xlu1 %294  ;;  %v388_v58 = vrot.slane %v316_v55, 4 }
  0x9c   : > { %v303_v38 = vmul.f32 %v295_v36, %v795_v23  ;;  %v297_v47 = vsel %vm296_vm4, %v293_v40, %v295_v36 }
  0x9d   : > { %v302_v51 = vmul.f32 %v297_v47, %v793_v22 }
  0x9e   : > { %377 = vrot.lane.b32.xlu0 %v303_v38, %s724_s11  ;;  %432 = vrot.lane.b32.xlu1 %v339_v37, %s723_s10 }
  0xa2   : > { %459 = vrot.lane.b32.xlu0 %v352_v41, %s722_s9  ;;  %373 = vrot.lane.b32.xlu1 %v301_v42, %s724_s11 }
  0xa6   : > { %434 = vrot.lane.b32.xlu0 %v340_v45, %s723_s10  ;;  %361 = vrot.lane.b32.xlu1 %v357_v27, %s725_s12 }
  0xaa   : > { %422 = vrot.lane.b32.xlu0 %v417_v50, %s726_s13  ;;  %375 = vrot.lane.b32.xlu1 %v302_v51, %s724_s11  ;;  %v270_v51 = vmul.f32 %v779_v15, %v787_v18 }
  0xae   : > { %418 = vrot.lane.b32.xlu0 %v415_v53, %s726_s13  ;;  %420 = vrot.lane.b32.xlu1 %v416_v54, %s726_s13  ;;  %v475_v53 = vld [vmem:[%s856_s1] sm:$0xff] }
  0xb2   : > { %394 = vrot.lane.b32.xlu0 %v389_v59, %s728_s14  ;;  %392 = vrot.lane.b32.xlu1 %v388_v58, %s728_s14 }
  0xb6   : > { %390 = vrot.lane.b32.xlu0 %v387_v62, %s728_s14  ;;  %359 = vrot.lane.b32.xlu1 %v356_v19, %s725_s12 }
  0xba   : > { %363 = vrot.lane.b32.xlu0 %v358_v35, %s725_s12 }
  0xbe   : > { %479 = vperm.xlu0 %704, %v476_v63  }
  0xf5   : > { %v402_v0 = vpop.permute.xlu1 %401 }
  0xf7   : > { %v444_v1 = vpop.permute.xlu0 %443 }
  0xf9   : > { %v404_v2 = vpop.permute.xlu1 %403 }
  0xfa   : > { %v408_v31 = vsel %vm407_vm10, %v402_v0, %v404_v2 }
  0xfb   : > { %v406_v3 = vpop.permute.xlu0 %405 }
  0xfc   : > { %v409_v32 = vsel %vm407_vm10, %v404_v2, %v406_v3 }
  0xff   : > { %v446_v5 = vpop.permute.xlu0 %445 }
 0x100   : > { %v462_v4 = vpop.permute.xlu1 %461  ;;  %v450_v20 = vsel %vm449_vm8, %v444_v1, %v446_v5 }
 0x103   : > { %v458_v7 = vpop.permute.xlu0 %457 }
 0x108   : > { %v437_v6 = vpop.permute.xlu1 %436 }
 0x10c   : > { %v448_v8 = vpop.permute.xlu1 %447 }
 0x10d   : > { %v451_v21 = vsel %vm449_vm8, %v446_v5, %v448_v8 }
 0x110   : > { %v433_v9 = vpop.permute.xlu1 %432  ;;  %v378_v10 = vpop.permute.xlu0 %377 }
 0x114   : > { %v374_v11 = vpop.permute.xlu1 %373  ;;  %v460_v12 = vpop.permute.xlu0 %459 }
 0x115   : > { %v465_v13 = vsel %vm463_vm6, %v460_v12, %v462_v4  ;;  %v464_v14 = vsel %vm463_vm6, %v458_v7, %v460_v12 }
 0x116   : > { %673 = vmatprep.subr.msk.mxu0 %vm466_vm7, %v465_v13 }
 0x117   : > { %674 = vmatpush1.msk.msra.mxu0 %vm466_vm7, %v464_v14 }
 0x118   : > { %v362_v17 = vpop.permute.xlu1 %361  ;;  %v435_v19 = vpop.permute.xlu0 %434 }
 0x119   : > { %v439_v23 = vsel %vm438_vm9, %v433_v9, %v435_v19  ;;  %v440_v24 = vsel %vm438_vm9, %v435_v19, %v437_v6 }
 0x11a   : > { %v474_v25 = vsel %vm466_vm7, %v440_v24, %v451_v21  ;;  %v473_v26 = vsel %vm466_vm7, %v439_v23, %v450_v20 }
 0x11b   : > { %514 = vmatprep.subr.mxu0 %v474_v25 }
 0x11c   : > { %v376_v27 = vpop.permute.xlu1 %375  ;;  %515 = vmatpush1.msra.mxu0 %v473_v26  ;;  %v423_v28 = vpop.permute.xlu0 %422 }
 0x11d   : > { %v381_v39 = vsel %vm379_vm12, %v376_v27, %v378_v10  ;;  %v380_v43 = vsel %vm379_vm12, %v374_v11, %v376_v27 }
 0x120   : > { %v421_v29 = vpop.permute.xlu1 %420  ;;  %v419_v30 = vpop.permute.xlu0 %418 }
 0x121   : > { %v426_v33 = vsel %vm424_vm11, %v421_v29, %v423_v28  ;;  %v425_v34 = vsel %vm424_vm11, %v419_v30, %v421_v29 }
 0x122   : > { %v472_v35 = vsel %vm466_vm7, %v409_v32, %v426_v33  ;;  %v471_v36 = vsel %vm466_vm7, %v408_v31, %v425_v34 }
 0x123   : > { %516 = vmatprep.subr.mxu0 %v472_v35 }
 0x124   : > { %v393_v37 = vpop.permute.xlu1 %392  ;;  %517 = vmatpush1.msra.mxu0 %v471_v36  ;;  %v395_v38 = vpop.permute.xlu0 %394 }
 0x125   : > { %v398_v40 = vsel %vm396_vm13, %v393_v37, %v395_v38 }
 0x126   : > { %v470_v41 = vsel %vm466_vm7, %v381_v39, %v398_v40 }
 0x127   : > { %518 = vmatprep.subr.mxu0 %v470_v41 }
 0x128   : > { %v391_v42 = vpop.permute.xlu0 %390  ;;  %v360_v44 = vpop.permute.xlu1 %359 }
 0x129   : > { %v397_v45 = vsel %vm396_vm13, %v391_v42, %v393_v37  ;;  %v366_v47 = vsel %vm365_vm14, %v360_v44, %v362_v17 }
 0x12a   : > { %v469_v46 = vsel %vm466_vm7, %v380_v43, %v397_v45  ;;  %v467_v54 = vsel %vm466_vm7, %v270_v51, %v366_v47 }
 0x12b   : > { %519 = vmatpush1.msra.mxu0 %v469_v46 }
 0x12c   : > { %v364_v48 = vpop.permute.xlu0 %363 }
 0x12d   : > { %v367_v50 = vsel %vm365_vm14, %v362_v17, %v364_v48 }
 0x12e   : > { %v468_v52 = vsel %vm466_vm7, %v271_v49, %v367_v50 }
 0x12f   : > { %520 = vmatprep.subr.mxu0 %v468_v52 }
 0x130   : > { %521 = vmatpush1.msra.mxu0 %v467_v54 }
 0x131   : > { %675 = vmatmul.mubr.msk.f32.vlgmr.msra.gmra.mxu0 %vm482_vm15, %v475_v53 }
 0x139   : > { %v480_v55 = vpop.permute.xlu0 %479 }
 0x1f1   : > { %v556_v56 = vpop.f32.mrf.mxu0 }
 0x1f2   : > { %v557_v15 = vadd.f32 %v556_v56, %v480_v55 }
 0x1f3   : > { %v558_v16 = vpop.f32.mrf.mxu0 }
 0x1f4   : > { %v559_v18 = vadd.f32 %v558_v16, %v480_v55  ;;  %561 = vst [vmem:[%s231_s25] sm:$0xff] %v557_v15 }
 0x1f6   : > { %562 = vst [vmem:[%s231_s25 + $0x8] sm:$0xff] %v559_v18  ;;  %v563_v22 = vadd.f32 %v559_v18, %v557_v15 }
 0x1f8   : > { %564 = vadd.xlane.f32.xlu1 %v563_v22 }
 0x281   : > { %v565_v57 = vpop.xlane.xlu1 %564 }
 0x282   : > { %v566_v58 = vmul.f32 0.00390625, %v565_v57 }
 0x284   : > { %v567_v59 = vsub.f32 %v557_v15, %v566_v58  ;;  %v568_v60 = vsub.f32 %v559_v18, %v566_v58 }
 0x286   : > { %v569_v61 = vmul.f32 %v567_v59, %v567_v59  ;;  %v570_v62 = vmul.f32 %v568_v60, %v568_v60 }
 0x288   : > { %v571_v63 = vadd.f32 %v570_v62, %v569_v61 }
 0x28a   : > { %572 = vadd.xlane.f32.xlu0 %v571_v63 }
 0x313   : > { %v573_v0 = vpop.xlane.xlu0 %572 }
 0x314   : > { %v575_v1 = vsel %vm574_vm0, %v565_v57, %v573_v0 }
 0x315   : > { %576 = vst.msk [vmem:[%s235_s28] sm:$0xff] %vm296_vm4, %v575_v1 }
 0x316 PF: > { %s16_s18 = sadd.s32 1, %s712_s18  }
 0x317   : > { %p13_p4 = scmp.ge.s32.totalorder %s16_s18, 4  }
 0x319   :  { %15 = sbr.rel (!%p13_p4) target bundleno = 1 (0x1), region = 78 }

</bundles_post_ra>
